<compile_context>
chip_gen: v6e
topology: v6e:2x2x1
jax: 0.10.0
libtpu: 0.0.40
codegen_flags: <defaults>
</compile_context>

<pallas_src>
import math
from functools import partial

import jax
import jax.numpy as jnp
from jax.experimental import pallas as pl
from jax.experimental.pallas import tpu as pltpu

_INV_SQRT2 = 1.0 / math.sqrt(2.0)
_SQRT_2_OVER_PI = math.sqrt(2.0 / math.pi)


def _gelu_f32(h, approximate):
    if approximate:
        # tanh form (goes through the otherwise-idle EUP slot). Slightly
        # different numerics than the erf reference -- opt-in only.
        return 0.5 * h * (1.0 + jnp.tanh(_SQRT_2_OVER_PI * (h + 0.044715 * h * h * h)))
    # exact erf GELU: x * 0.5 * (1 + erf(x/sqrt(2))) -- matches torch.erf gelu.
    return h * 0.5 * (1.0 + jax.lax.erf(h * _INV_SQRT2))


def ffn_kernel(x_ref, w1_ref, b1_ref, w2_ref, b2_ref, o_ref, *scratch,
               n_f_steps, approximate_gelu):
    # x:(tm,d_model) w1:(d_model,tf) b1:(1,tf) w2:(tf,d_model) b2:(1,d_model)
    # o:(tm,d_model); optional acc:(tm,d_model) f32 scratch when n_f_steps > 1.
    acc_ref = scratch[0] if scratch else None

    # ff1 partial: h = x @ W1[:, f_blk] + b1[f_blk]   (MXU, f32 accumulation)
    h = jnp.dot(x_ref[...].astype(w1_ref.dtype), w1_ref[...],
                preferred_element_type=jnp.float32)
    h = h + b1_ref[...].astype(jnp.float32)

    # GELU in f32 on the VPU/EUP.
    h = _gelu_f32(h, approximate_gelu)

    # TODO(synk): nn.Dropout(p=0.1) is identity at inference; training-mode
    # dropout (pltpu.prng_random_bits mask) intentionally not applied here.

    # ff2 partial: h_f @ W2[f_blk, :]   (MXU, f32 accumulation)
    part = jnp.dot(h.astype(w2_ref.dtype), w2_ref[...],
                   preferred_element_type=jnp.float32)
    b2 = b2_ref[...].astype(jnp.float32)

    if n_f_steps == 1:
        # Resident-weight fast path: no accumulator round-trip at all.
        o_ref[...] = (part + b2).astype(o_ref.dtype)
    else:
        f = pl.program_id(1)

        @pl.when(f == 0)
        def _init():
            # Fold the ff2 bias into the accumulator init (no per-step add).
            acc_ref[...] = jnp.broadcast_to(b2, acc_ref.shape)

        @pl.when(f < n_f_steps - 1)
        def _accum():
            acc_ref[...] += part

        @pl.when(f == n_f_steps - 1)
        def _store():
            # Write the last partial straight to the output: saves one
            # (tm, d_model) f32 accumulator store + reload per row tile.
            o_ref[...] = (acc_ref[...] + part).astype(o_ref.dtype)


def _round_up(x, m):
    return ((x + m - 1) // m) * m


def _vmem_capacity_bytes():
    try:
        info = pltpu.get_tpu_info()
        cap = getattr(info, "vmem_capacity_bytes", None)
        if cap:
            return int(cap)
    except Exception:
        pass
    return 64 << 20  # conservative fallback (v7x-sized) if the query fails


def _choose_row_tiling(M, target_tm):
    """Row tile + row-step count. Keeps >= 2 row steps when possible and an
    even step count so the 'parallel' axis splits evenly across v7x's 2 TCs."""
    tm = min(max(8, _round_up(target_tm, 8)), max(8, _round_up(pl.cdiv(M, 2), 8)))
    n_rows = pl.cdiv(M, tm)
    if n_rows > 1 and n_rows % 2 == 1:
        tm = max(8, _round_up(pl.cdiv(M, n_rows + 1), 8))
        n_rows = pl.cdiv(M, tm)
        if n_rows % 2 == 1:
            n_rows += 1  # rare fallback: pad one extra (empty) row tile
    return tm, n_rows


def _cost_bytes(tm, tf, d_model, x_itemsize, w_itemsize):
    """Rough per-step VMEM footprint of the double-buffered pipeline."""
    return (2 * tm * d_model * x_itemsize          # x tile (double-buffered)
            + 2 * tm * d_model * x_itemsize        # output tile (double-buffered)
            + tm * d_model * 4                     # f32 accumulator scratch
            + 2 * 2 * d_model * tf * w_itemsize    # W1 + W2 slices (double-buffered)
            + 2 * (tf + d_model) * 4               # b1 / b2 (kept f32)
            + tm * tf * (4 + w_itemsize))          # f32 h + MXU-dtype copy temps


def _choose_tf(d_model, d_ff, tm, x_itemsize, w_itemsize, budget):
    """d_ff tile. Prefer resident weights (tf == d_ff, fetched once per call);
    otherwise the largest fitting 256-multiple divisor (full 256x256 MXU on
    v6e/v7x), then 128-multiples. Returns None if nothing fits at this tm."""
    if _cost_bytes(tm, d_ff, d_model, x_itemsize, w_itemsize) <= budget:
        return d_ff
    cands = [t for t in range(128, d_ff, 128) if d_ff % t == 0]
    fitting = [t for t in cands
               if _cost_bytes(tm, t, d_model, x_itemsize, w_itemsize) <= budget]
    if not fitting:
        return None
    return max(fitting, key=lambda t: (t % 256 == 0, t >= 512, t))


def _choose_tiles(M, d_model, d_ff, x_itemsize, w_itemsize, target_tm, budget):
    tm, n_rows = _choose_row_tiling(M, target_tm)
    while True:
        tf = _choose_tf(d_model, d_ff, tm, x_itemsize, w_itemsize, budget)
        if tf is not None:
            return tm, n_rows, tf
        if tm <= 8:
            # Nothing fits even at the minimum row tile: degrade to the
            # smallest lane-aligned d_ff slice (vmem_limit has headroom).
            divs = [t for t in range(128, d_ff, 128) if d_ff % t == 0]
            return tm, n_rows, (min(divs) if divs else d_ff)
        tm, n_rows = _choose_row_tiling(M, max(8, tm // 2))


def positionwise_feed_forward(x, w1, b1, w2, b2, *, tm=512, tf=None,
                              mxu_dtype=jnp.bfloat16, approximate_gelu=False,
                              vmem_budget_bytes=None, vmem_limit_bytes=None):
    """x: (B, T, d_model). Returns (B, T, d_model)."""
    B, T, d_model = x.shape
    d_ff = w1.shape[1]
    M = B * T

    # Ship the big weight matrices in the MXU dtype (bf16 by default): halves
    # streamed/resident weight bytes. For production, store them in bf16 so
    # this cast is a no-op. Tiny biases stay f32 (negligible bytes, free precision).
    w1 = w1.astype(mxu_dtype)
    w2 = w2.astype(mxu_dtype)
    b1_2d = b1.reshape(1, d_ff).astype(jnp.float32)
    b2_2d = b2.reshape(1, d_model).astype(jnp.float32)

    x_itemsize = jnp.dtype(x.dtype).itemsize
    w_itemsize = jnp.dtype(mxu_dtype).itemsize

    # Generation-aware VMEM budget (~90 MiB on 128 MiB v5e/v6e, ~45 MiB on 64 MiB v7x).
    cap = _vmem_capacity_bytes()
    if vmem_budget_bytes is None:
        vmem_budget_bytes = int(cap * 0.70)
    if vmem_limit_bytes is None:
        vmem_limit_bytes = int(min(cap, vmem_budget_bytes + (12 << 20)))

    if tf is None:
        tm, n_rows, tf = _choose_tiles(M, d_model, d_ff, x_itemsize,
                                       w_itemsize, tm, vmem_budget_bytes)
    else:
        tm, n_rows = _choose_row_tiling(M, tm)
    assert d_ff % tf == 0 and (tf == d_ff or tf % 128 == 0)

    n_f = d_ff // tf
    m_pad = n_rows * tm

    x2d = x.reshape(M, d_model)
    if m_pad != M:  # pad ragged B*T instead of shrinking the tile
        x2d = jnp.pad(x2d, ((0, m_pad - M), (0, 0)))

    kernel = partial(ffn_kernel, n_f_steps=n_f, approximate_gelu=approximate_gelu)

    scratch = []
    if n_f > 1:  # accumulator only needed when d_ff is actually streamed
        scratch.append(pltpu.VMEM((tm, d_model), jnp.float32))

    out2d = pl.pallas_call(
        kernel,
        out_shape=jax.ShapeDtypeStruct((m_pad, d_model), x.dtype),
        grid_spec=pltpu.PrefetchScalarGridSpec(
            num_scalar_prefetch=0,
            grid=(n_rows, n_f),                    # reduction (d_ff) axis last
            in_specs=[
                pl.BlockSpec((tm, d_model), lambda i, f: (i, 0)),   # x tile
                pl.BlockSpec((d_model, tf), lambda i, f: (0, f)),   # W1 (const when tf==d_ff)
                pl.BlockSpec((1, tf), lambda i, f: (0, f)),         # b1 slice
                pl.BlockSpec((tf, d_model), lambda i, f: (f, 0)),   # W2 (const when tf==d_ff)
                pl.BlockSpec((1, d_model), lambda i, f: (0, 0)),    # b2
            ],
            out_specs=pl.BlockSpec((tm, d_model), lambda i, f: (i, 0)),
            scratch_shapes=scratch,
        ),
        compiler_params=pltpu.CompilerParams(
            dimension_semantics=("parallel", "arbitrary"),
            vmem_limit_bytes=vmem_limit_bytes,
        ),
    )(x2d, w1, b1_2d, w2, b2_2d)

    if m_pad != M:
        out2d = out2d[:M]
    return out2d.reshape(B, T, d_model)


def init_params(key, d_model, d_ff, dtype=jnp.float32):
    """Deterministic init mirroring nn.Linear defaults: U(-1/sqrt(fan_in), +1/sqrt(fan_in))."""
    k1, k2, k3, k4 = jax.random.split(key, 4)
    bound1 = 1.0 / math.sqrt(d_model)
    bound2 = 1.0 / math.sqrt(d_ff)
    w1 = jax.random.uniform(k1, (d_model, d_ff), dtype, -bound1, bound1)
    b1 = jax.random.uniform(k2, (d_ff,), dtype, -bound1, bound1)
    w2 = jax.random.uniform(k3, (d_ff, d_model), dtype, -bound2, bound2)
    b2 = jax.random.uniform(k4, (d_model,), dtype, -bound2, bound2)
    return w1, b1, w2, b2


def _reference(x, w1, b1, w2, b2):
    h = jnp.dot(x, w1) + b1
    h = h * 0.5 * (1.0 + jax.lax.erf(h / math.sqrt(2.0)))
    return jnp.dot(h, w2) + b2


if __name__ == "__main__":
    key = jax.random.PRNGKey(0)
    kx, kp, kx3, kp3 = jax.random.split(key, 4)

    # Case 1/2: small aligned shape.
    d_model, d_ff = 256, 512
    w1, b1, w2, b2 = init_params(kp, d_model, d_ff)
    B, T = 2, 8
    x = jax.random.normal(kx, (B, T, d_model), dtype=jnp.float32)
    ref = _reference(x, w1, b1, w2, b2)

    # Exact f32 MXU path (matches the torch erf-GELU reference tightly).
    out_f32 = jax.block_until_ready(
        positionwise_feed_forward(x, w1, b1, w2, b2, mxu_dtype=jnp.float32))
    assert out_f32.shape == (B, T, d_model)
    assert jnp.allclose(out_f32, ref, atol=1e-4, rtol=1e-4), "f32 path mismatch"

    # Intended production usage: weights stored in bf16, resident in VMEM.
    w1_bf, w2_bf = w1.astype(jnp.bfloat16), w2.astype(jnp.bfloat16)
    out_bf16 = jax.block_until_ready(
        positionwise_feed_forward(x, w1_bf, b1, w2_bf, b2))
    assert out_bf16.shape == (B, T, d_model)
    assert jnp.allclose(out_bf16, ref, atol=2e-2, rtol=2e-2), "bf16 path mismatch"

    # Opt-in tanh GELU (perf path): looser tolerance vs the erf reference.
    out_tanh = jax.block_until_ready(
        positionwise_feed_forward(x, w1_bf, b1, w2_bf, b2, approximate_gelu=True))
    assert jnp.allclose(out_tanh, ref, atol=5e-2, rtol=5e-2), "tanh-gelu path mismatch"

    # Case 3: module-default d_model=300 with ragged B*T (exercises non-128
    # lane width as a full-dim block plus the row-padding path).
    d_model3, d_ff3 = 300, 512
    w1_3, b1_3, w2_3, b2_3 = init_params(kp3, d_model3, d_ff3)
    B3, T3 = 2, 7
    x3 = jax.random.normal(kx3, (B3, T3, d_model3), dtype=jnp.float32)
    out3 = jax.block_until_ready(
        positionwise_feed_forward(x3, w1_3, b1_3, w2_3, b2_3, mxu_dtype=jnp.float32))
    ref3 = _reference(x3, w1_3, b1_3, w2_3, b2_3)
    assert out3.shape == (B3, T3, d_model3)
    assert jnp.allclose(out3, ref3, atol=1e-4, rtol=1e-4), "ragged/300-d path mismatch"

    print("KERNEL_OK")
</pallas_src>

<mosaic_0001>
module attributes {stable_mosaic.version = 11 : i64} {
  func.func @ffn_kernel(%arg0: i32, %arg1: i32, %arg2: memref<8x256xf32, #tpu.memory_space<vmem>>, %arg3: memref<256x512xf32, #tpu.memory_space<vmem>>, %arg4: memref<1x512xf32, #tpu.memory_space<vmem>>, %arg5: memref<512x256xf32, #tpu.memory_space<vmem>>, %arg6: memref<1x256xf32, #tpu.memory_space<vmem>>, %arg7: memref<8x256xf32, #tpu.memory_space<vmem>>) attributes {dimension_semantics = [#tpu.dimension_semantics<parallel>, #tpu.dimension_semantics<arbitrary>], iteration_bounds = array<i64: 2, 1>, scalar_prefetch = 0 : i64, scratch_operands = 0 : i64, tpu.core_type = #tpu.core_type<tc>, window_params = [{transform_indices = @transform_0, window_bounds = array<i64: 8, 256>}, {transform_indices = @transform_1, window_bounds = array<i64: 256, 512>}, {transform_indices = @transform_2, window_bounds = array<i64: 1, 512>}, {transform_indices = @transform_3, window_bounds = array<i64: 512, 256>}, {pipeline_mode = #tpu.pipeline_mode<synchronous>, transform_indices = @transform_4, window_bounds = array<i64: 1, 256>}, {transform_indices = @transform_5, window_bounds = array<i64: 8, 256>}]} {
    %c0 = arith.constant 0 : index
    %c0_0 = arith.constant 0 : index
    %0 = vector.load %arg2[%c0, %c0_0] : memref<8x256xf32, #tpu.memory_space<vmem>>, vector<8x256xf32>
    %c0_1 = arith.constant 0 : index
    %c0_2 = arith.constant 0 : index
    %1 = vector.load %arg3[%c0_1, %c0_2] : memref<256x512xf32, #tpu.memory_space<vmem>>, vector<256x512xf32>
    %cst = arith.constant dense<0.000000e+00> : vector<8x512xf32>
    %2 = tpu.matmul %0, %1, %cst {dimension_numbers = #tpu.dot_dimension_numbers<[1], [0], [0], [1], [0, 0, 1, 1], [], []>} : vector<8x256xf32>, vector<256x512xf32>, vector<8x512xf32> -> vector<8x512xf32>
    %c0_3 = arith.constant 0 : index
    %c0_4 = arith.constant 0 : index
    %3 = vector.load %arg4[%c0_3, %c0_4] : memref<1x512xf32, #tpu.memory_space<vmem>>, vector<1x512xf32>
    %4 = vector.broadcast %3 : vector<1x512xf32> to vector<8x512xf32>
    %5 = arith.addf %2, %4 : vector<8x512xf32>
    %cst_5 = arith.constant 5.000000e-01 : f32
    %6 = vector.broadcast %cst_5 : f32 to vector<8x512xf32>
    %7 = arith.mulf %5, %6 : vector<8x512xf32>
    %cst_6 = arith.constant 0.707106769 : f32
    %8 = vector.broadcast %cst_6 : f32 to vector<8x512xf32>
    %9 = arith.mulf %5, %8 : vector<8x512xf32>
    %10 = math.erf %9 : vector<8x512xf32>
    %cst_7 = arith.constant 1.000000e+00 : f32
    %11 = vector.broadcast %cst_7 : f32 to vector<8x512xf32>
    %12 = arith.addf %11, %10 : vector<8x512xf32>
    %13 = arith.mulf %7, %12 : vector<8x512xf32>
    %c0_8 = arith.constant 0 : index
    %c0_9 = arith.constant 0 : index
    %14 = vector.load %arg5[%c0_8, %c0_9] : memref<512x256xf32, #tpu.memory_space<vmem>>, vector<512x256xf32>
    %cst_10 = arith.constant dense<0.000000e+00> : vector<8x256xf32>
    %15 = tpu.matmul %13, %14, %cst_10 {dimension_numbers = #tpu.dot_dimension_numbers<[1], [0], [0], [1], [0, 0, 1, 1], [], []>} : vector<8x512xf32>, vector<512x256xf32>, vector<8x256xf32> -> vector<8x256xf32>
    %c0_11 = arith.constant 0 : index
    %c0_12 = arith.constant 0 : index
    %16 = vector.load %arg6[%c0_11, %c0_12] : memref<1x256xf32, #tpu.memory_space<vmem>>, vector<1x256xf32>
    %17 = vector.broadcast %16 : vector<1x256xf32> to vector<8x256xf32>
    %18 = arith.addf %15, %17 : vector<8x256xf32>
    %c0_13 = arith.constant 0 : index
    %c0_14 = arith.constant 0 : index
    %19 = vector.load %arg7[%c0_13, %c0_14] : memref<8x256xf32, #tpu.memory_space<vmem>>, vector<8x256xf32>
    tpu.vector_store %arg7[%c0_13, %c0_14], %18 {strides = array<i32>} : memref<8x256xf32, #tpu.memory_space<vmem>>, vector<8x256xf32>,
    return
  }
  func.func @transform_0(%arg0: i32, %arg1: i32) -> (i32, i32) {
    %c0_i32 = arith.constant 0 : i32
    %c0_i32_0 = arith.constant 0 : i32
    return %arg0, %c0_i32 : i32, i32
  }
  func.func @transform_1(%arg0: i32, %arg1: i32) -> (i32, i32) {
    %c0_i32 = arith.constant 0 : i32
    %c0_i32_0 = arith.constant 0 : i32
    return %c0_i32, %arg1 : i32, i32
  }
  func.func @transform_2(%arg0: i32, %arg1: i32) -> (i32, i32) {
    %c0_i32 = arith.constant 0 : i32
    %c0_i32_0 = arith.constant 0 : i32
    return %c0_i32, %arg1 : i32, i32
  }
  func.func @transform_3(%arg0: i32, %arg1: i32) -> (i32, i32) {
    %c0_i32 = arith.constant 0 : i32
    %c0_i32_0 = arith.constant 0 : i32
    return %arg1, %c0_i32 : i32, i32
  }
  func.func @transform_4(%arg0: i32, %arg1: i32) -> (i32, i32) {
    %c0_i32 = arith.constant 0 : i32
    %c0_i32_0 = arith.constant 0 : i32
    %c0_i32_1 = arith.constant 0 : i32
    return %c0_i32, %c0_i32_0 : i32, i32
  }
  func.func @transform_5(%arg0: i32, %arg1: i32) -> (i32, i32) {
    %c0_i32 = arith.constant 0 : i32
    %c0_i32_0 = arith.constant 0 : i32
    return %arg0, %c0_i32 : i32, i32
  }
}

</mosaic_0001>

<bundles_post_ra>
// kernel: tpu_custom_call.1
= control target key start
LH: loop header
LB: loop body
LE: loop exit
PB: predicated region body
PF: predicated region fallthrough
CT: control target
= control target key end

     0   :  { %s1609_s0 = inlined_call_operand.hbm [shape: f32[16,256], index: 0, kind: input, shape index: {}]   ;;  %s1610_s1 = inlined_call_operand.hbm [shape: f32[256,512], index: 1, kind: input, shape index: {}]   ;;  %s1611_s2 = inlined_call_operand.hbm [shape: f32[1,512], index: 2, kind: input, shape index: {}]   ;;  %s1612_s3 = inlined_call_operand.hbm [shape: f32[512,256], index: 3, kind: input, shape index: {}]   ;;  %s1613_s4 = inlined_call_operand.vmem [shape: f32[1,256], index: 4, kind: input, shape index: {}]   ;;  %s1614_s5 = inlined_call_operand.hbm [shape: f32[16,256], index: 5, kind: output, shape index: {}]  }
   0x1   :  { %1619 = sst [smem:[#allocation15_spill]] %s1610_s1 }
   0x2   :  { %10 = vsyncpa [#allocation3], 0 }
   0x3   :  { %12 = vsyncpa [#allocation3 + $0x1], 0 }
   0x4   :  { %13 = vsyncpa [#allocation6], 0 }
   0x5   :  { %14 = vsyncpa [#allocation9], 0 }
   0x6   :  { %15 = vsyncpa [#allocation4], 0 }
   0x7   :  { %17 = vsyncpa [#allocation4 + $0x1], 0  ;;  %s1412_s18 = smov 0   ;;  %s1414_s19 = smov 0  }
   0x8   :  { %s1416_s20 = smov 0   ;;  %s1418_s21 = smov 0  }
   0x9   :  { %s1420_s22 = smov 0   ;;  %s1422_s23 = smov 0  }
   0xa LB: > { %s1049_s24 = sadd.s32 4294967295, %s1371_s23   ;;  %s1050_s25 = sadd.s32 4294967294, %s1371_s23   ;;  %s1371_s23 = sphi %s1422_s23, %s23_s23   ;;  %s1367_s22 = sphi %s1420_s22, %s1638_s22   ;;  %s1363_s21 = sphi %s1418_s21, %s1637_s21   ;;  %s1359_s20 = sphi %s1416_s20, %s1636_s20   ;;  %s1355_s19 = sphi %s1414_s19, %s1635_s19   ;;  %s1351_s18 = sphi %s1412_s18, %s1634_s18  }
   0xb   : > { %p55_p0 = scmp.ne.s32.totalorder %s1355_s19, %s1351_s18  ;;  %p1446_p1 = scmp.eq.s32.totalorder %s1049_s24, 0 }
   0xc   : > { %p1450_p2 = scmp.eq.s32.totalorder %s1049_s24, 1  ;;  %p184_p3 = scmp.eq.s32.totalorder %s1050_s25, 1 }
   0xd   : > { %s1620_s26 = scalar_select %p1446_p1, 1, 0 }
   0xe   : > { %p1456_p4 = por %p1446_p1, %p55_p0  ;;  %p1051_p5 = scmp.ge.s32.totalorder %s1371_s23, 1 }
   0xf   : > { %p1461_p6 = por %p184_p3, %p55_p0  ;;  %p191_p7 = scmp.lt.s32.totalorder %s1371_s23, 3 }
  0x10   : > { %s1622_s28 = scalar_select %p1456_p4, 1, 0 }
  0x11   : > { %s1623_s29 = scalar_select %p1461_p6, 1, 0 }
  0x12   : > { %p1466_p8 = pnand %p1051_p5, %p191_p7  ;;  %s1373_s6 = smov [#allocation5]  }
  0x13   : > { %s206_s7 = sshll.u32 %s1373_s6, 4  ;;  %s1374_s9 = smov [#allocation7]   ;;  %s207_s7 = int_to_ptr.vmem [resolvable:$true] %s206_s7 }
  0x14   : > { %s1624_s30 = scalar_select %p1466_p8, 1, 0 }
  0x15   : > { %p1088_p9 = pneg %p1466_p8  ;;  %s223_s10 = sshll.u32 %s1374_s9, 4  ;;  %s224_s10 = int_to_ptr.vmem [resolvable:$true] %s223_s10 }
  0x16   : > { %s1375_s11 = smov [#allocation8]   ;;  %s1188_s13 = scalar_lea.vmem %s207_s7, 16384 }
  0x17   : > { %p1475_p11 = pnand %p1088_p9, %p1446_p1  ;;  %s237_s12 = sshll.u32 %s1375_s11, 4  ;;  %s238_s12 = int_to_ptr.vmem [resolvable:$true] %s237_s12 }
  0x18   : > { %p1189_p13 = scmp.ne.s32.totalorder %s207_s7, %s1188_s13  ;;  %p1196_p5 = scmp.lt.s32.totalorder %s207_s7, %s207_s7 }
  0x19   : > { %p1179_p12 = pneg %p1475_p11  ;;  %p1197_p7 = scmp.lt.s32.totalorder %s1188_s13, %s1188_s13 }
  0x1b   : > { %p1191_p0 = pnand %p1189_p13, %p1179_p12  ;;  %p1198_p9 = por %p1197_p7, %p1196_p5 }
  0x1d   : > { %p1192_p3 = pneg %p1191_p0 }
  0x1f   : > { %p1199_p10 = pnand %p1198_p9, %p1192_p3 }
  0x21   : > { %1202 = shalt.err (!%p1199_p10)
}
  0x22   : > { %s1376_s14 = smov 512   ;;  %s1377_s15 = smov 32  }
  0x23   : > { %s1626_s1 = sld [smem:[#allocation15_spill]]  ;;  %s1214_s24 = scalar_lea.vmem %s224_s10, 64 }
  0x24   : > { %p1215_p6 = scmp.ne.s32.totalorder %s224_s10, %s1214_s24  ;;  %p1222_p1 = scmp.lt.s32.totalorder %s224_s10, %s224_s10 }
  0x25   : > { %p1223_p4 = scmp.lt.s32.totalorder %s1214_s24, %s1214_s24 }
  0x26   : > { %p1217_p13 = pnand %p1215_p6, %p1179_p12 }
  0x27   : > { %p1224_p5 = por %p1223_p4, %p1222_p1 }
  0x28   : > { %p1218_p0 = pneg %p1217_p13 }
  0x29   : > { %1091 = dma.hbm_to_vmem [thread:$0]  (!%p1475_p11), %s1626_s1, 16384, %s207_s7, [#allocation6], %s1376_s14, %s1376_s14, %s1377_s15  }
  0x2a   : > { %p1225_p3 = pnand %p1224_p5, %p1218_p0 }
  0x2c   : > { %1228 = shalt.err (!%p1225_p3)
}
  0x2d   : > { %1094 = dma.hbm_to_vmem [thread:$0]  (!%p1475_p11), %s1611_s2, 64, %s224_s10, [#allocation6]  }
  0x2e   : > { %s1240_s7 = scalar_lea.vmem %s238_s12, 16384  ;;  %p1248_p9 = scmp.lt.s32.totalorder %s238_s12, %s238_s12 }
  0x2f   : > { %p1241_p10 = scmp.ne.s32.totalorder %s238_s12, %s1240_s7  ;;  %p1249_p13 = scmp.lt.s32.totalorder %s1240_s7, %s1240_s7 }
  0x31   : > { %p1243_p7 = pnand %p1241_p10, %p1179_p12  ;;  %p1250_p8 = por %p1249_p13, %p1248_p9 }
  0x33   : > { %p1244_p6 = pneg %p1243_p7 }
  0x35   : > { %p1251_p1 = pnand %p1250_p8, %p1244_p6 }
  0x37   : > { %1254 = shalt.err (!%p1251_p1)
}
  0x38   : > { %s1378_s9 = smov 256   ;;  %s1379_s10 = smov 16  }
  0x39   : > { %1097 = dma.hbm_to_vmem [thread:$0]  (!%p1475_p11), %s1612_s3, 16384, %s238_s12, [#allocation9], %s1378_s9, %s1378_s9, %s1379_s10  }
  0x3a   : > { %s42_s14 = sadd.s32 1, %s1359_s20  ;;  %s35_s15 = sadd.s32 1, %s1367_s22 }
  0x3b   : > { %p49_p4 = scmp.ne.s32.totalorder %s1359_s20, %s1355_s19  ;;  %p37_p8 = scmp.ge.s32.totalorder %s35_s15, 2 }
  0x3c   : > { %p50_p12 = scmp.eq.s32.totalorder %s1371_s23, 0  ;;  %p1109_p5 = scmp.lt.s32.totalorder %s1371_s23, 2 }
  0x3d   : > { %p1512_p0 = por %p1450_p2, %p49_p4  ;;  %s1640_s15 = smov (%p37_p8, %s35_s15), 0 }
  0x3e   : > { %p51_p3 = por %p50_p12, %p49_p4  ;;  %s254_s8 = sand.u32 1, %s1359_s20  }
  0x3f   : > { %s39_s17 = ssub.s32 %s1367_s22, %s1640_s15  ;;  %s1056_s12 = sshll.u32 %s254_s8, 4 }
  0x40   : > { %p40_p10 = scmp.eq.s32.totalorder %s39_s17, 0  ;;  %s1070_s24 = sshll.u32 %s1367_s22, 8 }
  0x41   : > { %s264_s27 = scalar_lea.hbm %s1609_s0, %s1070_s24  ;;  %s258_s9 = scalar_lea.vmem [#allocation2], %s1056_s12 }
  0x42   : > { %s1524_s25 = scalar_select %p40_p10, %s1359_s20, %s42_s14  }
  0x43   : > { %s266_s10 = sshll.u32 %s258_s9, 4  ;;  %p1531_p2 = pnand %p1109_p5, %p51_p3  ;;  %s267_s10 = int_to_ptr.vmem [resolvable:$true] %s266_s10 }
  0x44   : > { %s255_s13 = scalar_lea.sflag [#allocation3], %s254_s8  ;;  %s1268_s17 = scalar_lea.vmem %s267_s10, 256 }
  0x45   : > { %p1257_p11 = pneg %p1531_p2  ;;  %p1269_p7 = scmp.ne.s32.totalorder %s267_s10, %s1268_s17 }
  0x46   : > { %s1380_s14 = smov [#allocation2]  }
  0x47   : > { %p1271_p6 = pnand %p1269_p7, %p1257_p11  ;;  %s1273_s1 = sshll.u32 %s1380_s14, 4  ;;  %s1274_s1 = int_to_ptr.vmem [resolvable:$false] %s1273_s1 }
  0x48   : > { %s1275_s24 = scalar_lea.vmem %s1274_s1, 512  ;;  %p1276_p13 = scmp.lt.s32.totalorder %s267_s10, %s1274_s1 }
  0x49   : > { %p1272_p9 = pneg %p1271_p6  ;;  %p1277_p1 = scmp.lt.s32.totalorder %s1275_s24, %s1268_s17 }
  0x4b   : > { %p1278_p4 = por %p1277_p1, %p1276_p13 }
  0x4d   : > { %p1279_p8 = pnand %p1278_p4, %p1272_p9 }
  0x4f   : > { %1282 = shalt.err (!%p1279_p8)
}
  0x50   : > { %1101 = dma.hbm_to_vmem [thread:$0]  (!%p1531_p2), %s264_s27, 256, %s267_s10, %s255_s13  }
  0x51   : > { %p1629_p12 = scmp.ne.s32.totalorder %s1624_s30, 0 }
  0x52   : > { %s1542_s8 = sand.u32 (!%p1629_p12), 1, %s1355_s19   ;;  %p1630_p5 = scmp.ne.s32.totalorder (!%p1629_p12), %s1622_s28, 0 }
  0x53   : > { %275 = sbr.rel (%p1629_p12) target bundleno = 590 (0x24e), region = 40  ;;  %s1060_s12 = sshll.u32 (!%p1629_p12), %s1542_s8, 4 }
  0x54   : > { %s278_s6 = scalar_lea.sflag (!%p1629_p12), [#allocation3], %s1542_s8  ;;  %s1548_s1 = scalar_lea.vmem (!%p1629_p12), [#allocation2], %s1060_s12 }
  0x58   : > { %1334 = dma.done.wait (%p1630_p5), %s278_s6, 256  }
  0x59   : > { %1336 = vsyncadd (%p1630_p5), %s278_s6, 4294967040  ;;  %p1631_p3 = scmp.ne.s32.totalorder %s1620_s26, 0 }
  0x5b   : > { %1338 = dma.done.wait (%p1631_p3), [#allocation6], 16448  }
  0x5c   : > { %1340 = vsyncadd (%p1631_p3), [#allocation6], 4294950848 }
  0x5d   : > { %1342 = dma.done.wait (%p1631_p3), [#allocation9], 16384  }
  0x5e   : > { %1344 = vsyncadd (%p1631_p3), [#allocation9], 4294950912  ;;  %v386_v0 = vld [vmem:[#allocation5 + $0x1e8] sm:$0xff]  ;;  %v388_v1 = vld [vmem:[#allocation5 + $0x1f8] sm:$0xff]  ;;  %s1071_s30 = sshll.u32 %s1363_s21, 8  ;;  %s319_s7 = scalar_lea.vmem [#allocation10], %s1060_s12 }
  0x5f   : > { %v385_v2 = vld [vmem:[#allocation5 + $0x1e0] sm:$0xff]  ;;  %475 = vmatprep.subr.mxu0 %v386_v0  ;;  %546 = vmatprep.subr.mxu1 %v388_v1  ;;  %v387_v3 = vld [vmem:[#allocation5 + $0x1f0] sm:$0xff]  ;;  %v382_v4 = vld [vmem:[#allocation5 + $0x1c8] sm:$0xff]  ;;  %s936_s27 = sshll.u32 %s319_s7, 4  ;;  %s934_s11 = scalar_lea.hbm %s1614_s5, %s1071_s30  ;;  %s937_s27 = int_to_ptr.vmem [resolvable:$true] %s936_s27 }
  0x60   : > { %v384_v5 = vld [vmem:[#allocation5 + $0x1d8] sm:$0xff]  ;;  %476 = vmatpush1.msra.mxu0 %v385_v2  ;;  %547 = vmatpush1.msra.mxu1 %v387_v3  ;;  %v381_v6 = vld [vmem:[#allocation5 + $0x1c0] sm:$0xff]  ;;  %v383_v7 = vld [vmem:[#allocation5 + $0x1d0] sm:$0xff]  ;;  %s922_s13 = scalar_lea.sflag [#allocation4], %s1542_s8  ;;  %s1283_s17 = scalar_lea.vmem %s937_s27, 256 }
  0x61   : > { %v378_v8 = vld [vmem:[#allocation5 + $0x1a8] sm:$0xff]  ;;  %477 = vmatprep.subr.mxu0 %v382_v4  ;;  %548 = vmatprep.subr.mxu1 %v384_v5  ;;  %v380_v9 = vld [vmem:[#allocation5 + $0x1b8] sm:$0xff]  ;;  %v377_v10 = vld [vmem:[#allocation5 + $0x1a0] sm:$0xff]  ;;  %p1284_p10 = scmp.ne.s32.totalorder %s937_s27, %s1283_s17  ;;  %s1381_s21 = smov [#allocation10]  }
  0x62   : > { %v379_v11 = vld [vmem:[#allocation5 + $0x1b0] sm:$0xff]  ;;  %478 = vmatpush1.msra.mxu0 %v381_v6  ;;  %549 = vmatpush1.msra.mxu1 %v383_v7  ;;  %v374_v12 = vld [vmem:[#allocation5 + $0x188] sm:$0xff]  ;;  %v376_v13 = vld [vmem:[#allocation5 + $0x198] sm:$0xff]  ;;  %s1287_s14 = sshll.u32 %s1381_s21, 4  ;;  %s1288_s14 = int_to_ptr.vmem [resolvable:$false] %s1287_s14 }
  0x63   : > { %479 = vmatprep.subr.mxu0 %v378_v8  ;;  %550 = vmatprep.subr.mxu1 %v380_v9  ;;  %v373_v14 = vld [vmem:[#allocation5 + $0x180] sm:$0xff]  ;;  %v375_v15 = vld [vmem:[#allocation5 + $0x190] sm:$0xff]  ;;  %v370_v16 = vld [vmem:[#allocation5 + $0x168] sm:$0xff]  ;;  %p1285_p2 = pnand %p1284_p10, %p1512_p0  ;;  %s1289_s24 = scalar_lea.vmem %s1288_s14, 512 }
  0x64   : > { %480 = vmatpush1.msra.mxu0 %v377_v10  ;;  %551 = vmatpush1.msra.mxu1 %v379_v11  ;;  %v372_v17 = vld [vmem:[#allocation5 + $0x178] sm:$0xff]  ;;  %v369_v18 = vld [vmem:[#allocation5 + $0x160] sm:$0xff]  ;;  %v371_v19 = vld [vmem:[#allocation5 + $0x170] sm:$0xff]  ;;  %p1290_p7 = scmp.lt.s32.totalorder %s937_s27, %s1288_s14  ;;  %p1291_p6 = scmp.lt.s32.totalorder %s1289_s24, %s1283_s17 }
  0x65   : > { %481 = vmatprep.subr.mxu0 %v374_v12  ;;  %552 = vmatprep.subr.mxu1 %v376_v13  ;;  %v366_v20 = vld [vmem:[#allocation5 + $0x148] sm:$0xff]  ;;  %v368_v21 = vld [vmem:[#allocation5 + $0x158] sm:$0xff]  ;;  %v365_v22 = vld [vmem:[#allocation5 + $0x140] sm:$0xff]  ;;  %p1286_p11 = pneg %p1285_p2 }
  0x66   : > { %482 = vmatpush1.msra.mxu0 %v373_v14  ;;  %553 = vmatpush1.msra.mxu1 %v375_v15  ;;  %v367_v23 = vld [vmem:[#allocation5 + $0x150] sm:$0xff]  ;;  %v362_v24 = vld [vmem:[#allocation5 + $0x128] sm:$0xff]  ;;  %v364_v25 = vld [vmem:[#allocation5 + $0x138] sm:$0xff]  ;;  %p1292_p9 = por %p1291_p6, %p1290_p7 }
  0x67   : > { %483 = vmatprep.subr.mxu0 %v370_v16  ;;  %554 = vmatprep.subr.mxu1 %v372_v17  ;;  %v361_v26 = vld [vmem:[#allocation5 + $0x120] sm:$0xff]  ;;  %v363_v27 = vld [vmem:[#allocation5 + $0x130] sm:$0xff]  ;;  %v358_v28 = vld [vmem:[#allocation5 + $0x108] sm:$0xff] }
  0x68   : > { %484 = vmatpush1.msra.mxu0 %v369_v18  ;;  %555 = vmatpush1.msra.mxu1 %v371_v19  ;;  %v360_v29 = vld [vmem:[#allocation5 + $0x118] sm:$0xff]  ;;  %v357_v30 = vld [vmem:[#allocation5 + $0x100] sm:$0xff]  ;;  %v359_v31 = vld [vmem:[#allocation5 + $0x110] sm:$0xff]  ;;  %p1293_p13 = pnand %p1292_p9, %p1286_p11 }
  0x69   : > { %485 = vmatprep.subr.mxu0 %v366_v20  ;;  %556 = vmatprep.subr.mxu1 %v368_v21  ;;  %v354_v32 = vld [vmem:[#allocation5 + $0xe8] sm:$0xff]  ;;  %v356_v33 = vld [vmem:[#allocation5 + $0xf8] sm:$0xff]  ;;  %v353_v34 = vld [vmem:[#allocation5 + $0xe0] sm:$0xff] }
  0x6a   : > { %486 = vmatpush1.msra.mxu0 %v365_v22  ;;  %557 = vmatpush1.msra.mxu1 %v367_v23  ;;  %v355_v35 = vld [vmem:[#allocation5 + $0xf0] sm:$0xff]  ;;  %v350_v36 = vld [vmem:[#allocation5 + $0xc8] sm:$0xff]  ;;  %v352_v37 = vld [vmem:[#allocation5 + $0xd8] sm:$0xff] }
  0x6b   : > { %487 = vmatprep.subr.mxu0 %v362_v24  ;;  %558 = vmatprep.subr.mxu1 %v364_v25  ;;  %v349_v38 = vld [vmem:[#allocation5 + $0xc0] sm:$0xff]  ;;  %v351_v39 = vld [vmem:[#allocation5 + $0xd0] sm:$0xff]  ;;  %v346_v40 = vld [vmem:[#allocation5 + $0xa8] sm:$0xff] }
  0x6c   : > { %488 = vmatpush1.msra.mxu0 %v361_v26  ;;  %559 = vmatpush1.msra.mxu1 %v363_v27  ;;  %v348_v41 = vld [vmem:[#allocation5 + $0xb8] sm:$0xff]  ;;  %v345_v42 = vld [vmem:[#allocation5 + $0xa0] sm:$0xff]  ;;  %v347_v43 = vld [vmem:[#allocation5 + $0xb0] sm:$0xff] }
  0x6d   : > { %489 = vmatprep.subr.mxu0 %v358_v28  ;;  %560 = vmatprep.subr.mxu1 %v360_v29  ;;  %v342_v44 = vld [vmem:[#allocation5 + $0x88] sm:$0xff]  ;;  %v344_v45 = vld [vmem:[#allocation5 + $0x98] sm:$0xff]  ;;  %v341_v46 = vld [vmem:[#allocation5 + $0x80] sm:$0xff] }
  0x6e   : > { %490 = vmatpush1.msra.mxu0 %v357_v30  ;;  %561 = vmatpush1.msra.mxu1 %v359_v31  ;;  %v343_v47 = vld [vmem:[#allocation5 + $0x90] sm:$0xff]  ;;  %v338_v48 = vld [vmem:[#allocation5 + $0x68] sm:$0xff]  ;;  %v340_v49 = vld [vmem:[#allocation5 + $0x78] sm:$0xff] }
  0x6f   : > { %491 = vmatprep.subr.mxu0 %v354_v32  ;;  %562 = vmatprep.subr.mxu1 %v356_v33  ;;  %v337_v50 = vld [vmem:[#allocation5 + $0x60] sm:$0xff]  ;;  %v339_v51 = vld [vmem:[#allocation5 + $0x70] sm:$0xff]  ;;  %v334_v52 = vld [vmem:[#allocation5 + $0x48] sm:$0xff] }
  0x70   : > { %492 = vmatpush1.msra.mxu0 %v353_v34  ;;  %563 = vmatpush1.msra.mxu1 %v355_v35  ;;  %v336_v53 = vld [vmem:[#allocation5 + $0x58] sm:$0xff]  ;;  %v333_v54 = vld [vmem:[#allocation5 + $0x40] sm:$0xff]  ;;  %v335_v55 = vld [vmem:[#allocation5 + $0x50] sm:$0xff] }
  0x71   : > { %493 = vmatprep.subr.mxu0 %v350_v36  ;;  %564 = vmatprep.subr.mxu1 %v352_v37  ;;  %v330_v56 = vld [vmem:[#allocation5 + $0x28] sm:$0xff]  ;;  %v332_v57 = vld [vmem:[#allocation5 + $0x38] sm:$0xff]  ;;  %v329_v58 = vld [vmem:[#allocation5 + $0x20] sm:$0xff] }
  0x72   : > { %494 = vmatpush1.msra.mxu0 %v349_v38  ;;  %565 = vmatpush1.msra.mxu1 %v351_v39  ;;  %v331_v59 = vld [vmem:[#allocation5 + $0x30] sm:$0xff]  ;;  %v326_v60 = vld [vmem:[#allocation5 + $0x8] sm:$0xff]  ;;  %v328_v61 = vld [vmem:[#allocation5 + $0x18] sm:$0xff] }
  0x73   : > { %495 = vmatprep.subr.mxu0 %v346_v40  ;;  %566 = vmatprep.subr.mxu1 %v348_v41  ;;  %v325_v62 = vld [vmem:[#allocation5] sm:$0xff]  ;;  %v327_v63 = vld [vmem:[#allocation5 + $0x10] sm:$0xff]  ;;  %v450_v0 = vld [vmem:[#allocation5 + $0x3e8] sm:$0xff] }
  0x74   : > { %496 = vmatpush1.msra.mxu0 %v345_v42  ;;  %567 = vmatpush1.msra.mxu1 %v347_v43  ;;  %v452_v1 = vld [vmem:[#allocation5 + $0x3f8] sm:$0xff]  ;;  %v449_v2 = vld [vmem:[#allocation5 + $0x3e0] sm:$0xff]  ;;  %v451_v3 = vld [vmem:[#allocation5 + $0x3f0] sm:$0xff] }
  0x75   : > { %497 = vmatprep.subr.mxu0 %v342_v44  ;;  %568 = vmatprep.subr.mxu1 %v344_v45  ;;  %v446_v4 = vld [vmem:[#allocation5 + $0x3c8] sm:$0xff]  ;;  %v448_v5 = vld [vmem:[#allocation5 + $0x3d8] sm:$0xff]  ;;  %v445_v6 = vld [vmem:[#allocation5 + $0x3c0] sm:$0xff] }
  0x76   : > { %498 = vmatpush1.msra.mxu0 %v341_v46  ;;  %569 = vmatpush1.msra.mxu1 %v343_v47  ;;  %v447_v7 = vld [vmem:[#allocation5 + $0x3d0] sm:$0xff]  ;;  %v442_v8 = vld [vmem:[#allocation5 + $0x3a8] sm:$0xff]  ;;  %v444_v9 = vld [vmem:[#allocation5 + $0x3b8] sm:$0xff] }
  0x77   : > { %499 = vmatprep.subr.mxu0 %v338_v48  ;;  %570 = vmatprep.subr.mxu1 %v340_v49  ;;  %v441_v10 = vld [vmem:[#allocation5 + $0x3a0] sm:$0xff]  ;;  %v443_v11 = vld [vmem:[#allocation5 + $0x3b0] sm:$0xff]  ;;  %v438_v12 = vld [vmem:[#allocation5 + $0x388] sm:$0xff] }
  0x78   : > { %500 = vmatpush1.msra.mxu0 %v337_v50  ;;  %571 = vmatpush1.msra.mxu1 %v339_v51  ;;  %v440_v13 = vld [vmem:[#allocation5 + $0x398] sm:$0xff]  ;;  %v437_v14 = vld [vmem:[#allocation5 + $0x380] sm:$0xff]  ;;  %v439_v15 = vld [vmem:[#allocation5 + $0x390] sm:$0xff] }
  0x79   : > { %501 = vmatprep.subr.mxu0 %v334_v52  ;;  %572 = vmatprep.subr.mxu1 %v336_v53  ;;  %v434_v16 = vld [vmem:[#allocation5 + $0x368] sm:$0xff]  ;;  %v436_v17 = vld [vmem:[#allocation5 + $0x378] sm:$0xff]  ;;  %v433_v18 = vld [vmem:[#allocation5 + $0x360] sm:$0xff] }
  0x7a   : > { %502 = vmatpush1.msra.mxu0 %v333_v54  ;;  %573 = vmatpush1.msra.mxu1 %v335_v55  ;;  %v435_v19 = vld [vmem:[#allocation5 + $0x370] sm:$0xff]  ;;  %v430_v20 = vld [vmem:[#allocation5 + $0x348] sm:$0xff]  ;;  %v432_v21 = vld [vmem:[#allocation5 + $0x358] sm:$0xff] }
  0x7b   : > { %503 = vmatprep.subr.mxu0 %v330_v56  ;;  %574 = vmatprep.subr.mxu1 %v332_v57  ;;  %v429_v22 = vld [vmem:[#allocation5 + $0x340] sm:$0xff]  ;;  %v431_v23 = vld [vmem:[#allocation5 + $0x350] sm:$0xff]  ;;  %v426_v24 = vld [vmem:[#allocation5 + $0x328] sm:$0xff] }
  0x7c   : > { %504 = vmatpush1.msra.mxu0 %v329_v58  ;;  %575 = vmatpush1.msra.mxu1 %v331_v59  ;;  %v428_v25 = vld [vmem:[#allocation5 + $0x338] sm:$0xff]  ;;  %v425_v26 = vld [vmem:[#allocation5 + $0x320] sm:$0xff]  ;;  %v427_v27 = vld [vmem:[#allocation5 + $0x330] sm:$0xff] }
  0x7d   : > { %505 = vmatprep.subr.mxu0 %v326_v60  ;;  %576 = vmatprep.subr.mxu1 %v328_v61  ;;  %v422_v28 = vld [vmem:[#allocation5 + $0x308] sm:$0xff]  ;;  %v424_v29 = vld [vmem:[#allocation5 + $0x318] sm:$0xff]  ;;  %v421_v30 = vld [vmem:[#allocation5 + $0x300] sm:$0xff] }
  0x7e   : > { %506 = vmatpush1.msra.mxu0 %v325_v62  ;;  %577 = vmatpush1.msra.mxu1 %v327_v63  ;;  %v423_v31 = vld [vmem:[#allocation5 + $0x310] sm:$0xff]  ;;  %v418_v32 = vld [vmem:[#allocation5 + $0x2e8] sm:$0xff]  ;;  %v420_v33 = vld [vmem:[#allocation5 + $0x2f8] sm:$0xff] }
  0x7f   : > { %507 = vmatprep.subr.mxu0 %v450_v0  ;;  %578 = vmatprep.subr.mxu1 %v452_v1  ;;  %v417_v34 = vld [vmem:[#allocation5 + $0x2e0] sm:$0xff]  ;;  %v419_v35 = vld [vmem:[#allocation5 + $0x2f0] sm:$0xff]  ;;  %v414_v36 = vld [vmem:[#allocation5 + $0x2c8] sm:$0xff] }
  0x80   : > { %508 = vmatpush2.msra.mxu0 %v449_v2  ;;  %579 = vmatpush2.msra.mxu1 %v451_v3  ;;  %v416_v37 = vld [vmem:[#allocation5 + $0x2d8] sm:$0xff]  ;;  %v413_v38 = vld [vmem:[#allocation5 + $0x2c0] sm:$0xff]  ;;  %v415_v39 = vld [vmem:[#allocation5 + $0x2d0] sm:$0xff] }
  0x81   : > { %509 = vmatprep.subr.mxu0 %v446_v4  ;;  %580 = vmatprep.subr.mxu1 %v448_v5  ;;  %v410_v40 = vld [vmem:[#allocation5 + $0x2a8] sm:$0xff]  ;;  %v412_v41 = vld [vmem:[#allocation5 + $0x2b8] sm:$0xff]  ;;  %v409_v42 = vld [vmem:[#allocation5 + $0x2a0] sm:$0xff] }
  0x82   : > { %510 = vmatpush2.msra.mxu0 %v445_v6  ;;  %581 = vmatpush2.msra.mxu1 %v447_v7  ;;  %v411_v43 = vld [vmem:[#allocation5 + $0x2b0] sm:$0xff]  ;;  %v406_v44 = vld [vmem:[#allocation5 + $0x288] sm:$0xff]  ;;  %v408_v45 = vld [vmem:[#allocation5 + $0x298] sm:$0xff] }
  0x83   : > { %511 = vmatprep.subr.mxu0 %v442_v8  ;;  %582 = vmatprep.subr.mxu1 %v444_v9  ;;  %v405_v46 = vld [vmem:[#allocation5 + $0x280] sm:$0xff]  ;;  %v407_v47 = vld [vmem:[#allocation5 + $0x290] sm:$0xff]  ;;  %v402_v48 = vld [vmem:[#allocation5 + $0x268] sm:$0xff] }
  0x84   : > { %512 = vmatpush2.msra.mxu0 %v441_v10  ;;  %583 = vmatpush2.msra.mxu1 %v443_v11  ;;  %v404_v49 = vld [vmem:[#allocation5 + $0x278] sm:$0xff]  ;;  %v401_v50 = vld [vmem:[#allocation5 + $0x260] sm:$0xff]  ;;  %v403_v51 = vld [vmem:[#allocation5 + $0x270] sm:$0xff] }
  0x85   : > { %513 = vmatprep.subr.mxu0 %v438_v12  ;;  %584 = vmatprep.subr.mxu1 %v440_v13  ;;  %v398_v52 = vld [vmem:[#allocation5 + $0x248] sm:$0xff]  ;;  %v400_v53 = vld [vmem:[#allocation5 + $0x258] sm:$0xff]  ;;  %v397_v54 = vld [vmem:[#allocation5 + $0x240] sm:$0xff] }
  0x86   : > { %514 = vmatpush2.msra.mxu0 %v437_v14  ;;  %585 = vmatpush2.msra.mxu1 %v439_v15  ;;  %v399_v55 = vld [vmem:[#allocation5 + $0x250] sm:$0xff]  ;;  %v394_v56 = vld [vmem:[#allocation5 + $0x228] sm:$0xff]  ;;  %v396_v57 = vld [vmem:[#allocation5 + $0x238] sm:$0xff] }
  0x87   : > { %515 = vmatprep.subr.mxu0 %v434_v16  ;;  %586 = vmatprep.subr.mxu1 %v436_v17  ;;  %v393_v58 = vld [vmem:[#allocation5 + $0x220] sm:$0xff]  ;;  %v395_v59 = vld [vmem:[#allocation5 + $0x230] sm:$0xff]  ;;  %v390_v60 = vld [vmem:[#allocation5 + $0x208] sm:$0xff] }
  0x88   : > { %516 = vmatpush2.msra.mxu0 %v433_v18  ;;  %587 = vmatpush2.msra.mxu1 %v435_v19  ;;  %v392_v61 = vld [vmem:[#allocation5 + $0x218] sm:$0xff]  ;;  %v389_v62 = vld [vmem:[#allocation5 + $0x200] sm:$0xff]  ;;  %v391_v0 = vld [vmem:[#allocation5 + $0x210] sm:$0xff] }
  0x89   : > { %517 = vmatprep.subr.mxu0 %v430_v20  ;;  %588 = vmatprep.subr.mxu1 %v432_v21  ;;  %v324_v63 = vld [vmem:[%s1548_s1 + $0x8] sm:$0xff]  ;;  %v323_v1 = vld [vmem:[%s1548_s1] sm:$0xff] }
  0x8a   : > { %518 = vmatpush2.msra.mxu0 %v429_v22  ;;  %589 = vmatpush2.msra.mxu1 %v431_v23  ;;  %v668_v2 = vld [vmem:[#allocation8 + $0xf8] sm:$0xff]  ;;  %v667_v4 = vld [vmem:[#allocation8 + $0xf0] sm:$0xff]  ;;  %v666_v6 = vld [vmem:[#allocation8 + $0xe8] sm:$0xff] }
  0x8b   : > { %519 = vmatprep.subr.mxu0 %v426_v24  ;;  %590 = vmatprep.subr.mxu1 %v428_v25  ;;  %v732_v3 = vld [vmem:[#allocation8 + $0x2f8] sm:$0xff]  ;;  %v731_v5 = vld [vmem:[#allocation8 + $0x2f0] sm:$0xff]  ;;  %v730_v7 = vld [vmem:[#allocation8 + $0x2e8] sm:$0xff] }
  0x8c   : > { %520 = vmatpush2.msra.mxu0 %v425_v26  ;;  %591 = vmatpush2.msra.mxu1 %v427_v27  ;;  %v665_v8 = vld [vmem:[#allocation8 + $0xe0] sm:$0xff]  ;;  %v664_v10 = vld [vmem:[#allocation8 + $0xd8] sm:$0xff]  ;;  %v663_v12 = vld [vmem:[#allocation8 + $0xd0] sm:$0xff] }
  0x8d   : > { %521 = vmatprep.subr.mxu0 %v422_v28  ;;  %592 = vmatprep.subr.mxu1 %v424_v29  ;;  %v729_v9 = vld [vmem:[#allocation8 + $0x2e0] sm:$0xff]  ;;  %v728_v11 = vld [vmem:[#allocation8 + $0x2d8] sm:$0xff]  ;;  %v727_v13 = vld [vmem:[#allocation8 + $0x2d0] sm:$0xff] }
  0x8e   : > { %522 = vmatpush2.msra.mxu0 %v421_v30  ;;  %593 = vmatpush2.msra.mxu1 %v423_v31  ;;  %v662_v14 = vld [vmem:[#allocation8 + $0xc8] sm:$0xff]  ;;  %v661_v16 = vld [vmem:[#allocation8 + $0xc0] sm:$0xff]  ;;  %v660_v18 = vld [vmem:[#allocation8 + $0xb8] sm:$0xff] }
  0x8f   : > { %523 = vmatprep.subr.mxu0 %v418_v32  ;;  %594 = vmatprep.subr.mxu1 %v420_v33  ;;  %v726_v15 = vld [vmem:[#allocation8 + $0x2c8] sm:$0xff]  ;;  %v725_v17 = vld [vmem:[#allocation8 + $0x2c0] sm:$0xff]  ;;  %v724_v19 = vld [vmem:[#allocation8 + $0x2b8] sm:$0xff] }
  0x90   : > { %524 = vmatpush2.msra.mxu0 %v417_v34  ;;  %595 = vmatpush2.msra.mxu1 %v419_v35  ;;  %v659_v20 = vld [vmem:[#allocation8 + $0xb0] sm:$0xff]  ;;  %v658_v22 = vld [vmem:[#allocation8 + $0xa8] sm:$0xff]  ;;  %v657_v24 = vld [vmem:[#allocation8 + $0xa0] sm:$0xff] }
  0x91   : > { %525 = vmatprep.subr.mxu0 %v414_v36  ;;  %596 = vmatprep.subr.mxu1 %v416_v37  ;;  %v723_v21 = vld [vmem:[#allocation8 + $0x2b0] sm:$0xff]  ;;  %v722_v23 = vld [vmem:[#allocation8 + $0x2a8] sm:$0xff]  ;;  %v721_v25 = vld [vmem:[#allocation8 + $0x2a0] sm:$0xff] }
  0x92   : > { %526 = vmatpush2.msra.mxu0 %v413_v38  ;;  %597 = vmatpush2.msra.mxu1 %v415_v39  ;;  %v656_v26 = vld [vmem:[#allocation8 + $0x98] sm:$0xff]  ;;  %v655_v28 = vld [vmem:[#allocation8 + $0x90] sm:$0xff]  ;;  %v654_v30 = vld [vmem:[#allocation8 + $0x88] sm:$0xff] }
  0x93   : > { %527 = vmatprep.subr.mxu0 %v410_v40  ;;  %598 = vmatprep.subr.mxu1 %v412_v41  ;;  %v720_v27 = vld [vmem:[#allocation8 + $0x298] sm:$0xff]  ;;  %v719_v29 = vld [vmem:[#allocation8 + $0x290] sm:$0xff]  ;;  %v718_v31 = vld [vmem:[#allocation8 + $0x288] sm:$0xff] }
  0x94   : > { %528 = vmatpush2.msra.mxu0 %v409_v42  ;;  %599 = vmatpush2.msra.mxu1 %v411_v43  ;;  %v653_v32 = vld [vmem:[#allocation8 + $0x80] sm:$0xff]  ;;  %v652_v34 = vld [vmem:[#allocation8 + $0x78] sm:$0xff]  ;;  %v651_v36 = vld [vmem:[#allocation8 + $0x70] sm:$0xff] }
  0x95   : > { %529 = vmatprep.subr.mxu0 %v406_v44  ;;  %600 = vmatprep.subr.mxu1 %v408_v45  ;;  %v717_v33 = vld [vmem:[#allocation8 + $0x280] sm:$0xff]  ;;  %v716_v35 = vld [vmem:[#allocation8 + $0x278] sm:$0xff]  ;;  %v715_v37 = vld [vmem:[#allocation8 + $0x270] sm:$0xff] }
  0x96   : > { %530 = vmatpush2.msra.mxu0 %v405_v46  ;;  %601 = vmatpush2.msra.mxu1 %v407_v47  ;;  %v650_v38 = vld [vmem:[#allocation8 + $0x68] sm:$0xff]  ;;  %v649_v40 = vld [vmem:[#allocation8 + $0x60] sm:$0xff]  ;;  %v648_v42 = vld [vmem:[#allocation8 + $0x58] sm:$0xff] }
  0x97   : > { %531 = vmatprep.subr.mxu0 %v402_v48  ;;  %602 = vmatprep.subr.mxu1 %v404_v49  ;;  %v714_v39 = vld [vmem:[#allocation8 + $0x268] sm:$0xff]  ;;  %v713_v41 = vld [vmem:[#allocation8 + $0x260] sm:$0xff]  ;;  %v712_v43 = vld [vmem:[#allocation8 + $0x258] sm:$0xff] }
  0x98   : > { %532 = vmatpush2.msra.mxu0 %v401_v50  ;;  %603 = vmatpush2.msra.mxu1 %v403_v51  ;;  %v647_v44 = vld [vmem:[#allocation8 + $0x50] sm:$0xff]  ;;  %v646_v46 = vld [vmem:[#allocation8 + $0x48] sm:$0xff]  ;;  %v645_v48 = vld [vmem:[#allocation8 + $0x40] sm:$0xff] }
  0x99   : > { %533 = vmatprep.subr.mxu0 %v398_v52  ;;  %604 = vmatprep.subr.mxu1 %v400_v53  ;;  %v711_v45 = vld [vmem:[#allocation8 + $0x250] sm:$0xff]  ;;  %v710_v47 = vld [vmem:[#allocation8 + $0x248] sm:$0xff]  ;;  %v709_v49 = vld [vmem:[#allocation8 + $0x240] sm:$0xff] }
  0x9a   : > { %534 = vmatpush2.msra.mxu0 %v397_v54  ;;  %605 = vmatpush2.msra.mxu1 %v399_v55  ;;  %v644_v50 = vld [vmem:[#allocation8 + $0x38] sm:$0xff]  ;;  %v643_v52 = vld [vmem:[#allocation8 + $0x30] sm:$0xff]  ;;  %v642_v54 = vld [vmem:[#allocation8 + $0x28] sm:$0xff] }
  0x9b   : > { %535 = vmatprep.subr.mxu0 %v394_v56  ;;  %606 = vmatprep.subr.mxu1 %v396_v57  ;;  %v708_v51 = vld [vmem:[#allocation8 + $0x238] sm:$0xff]  ;;  %v707_v53 = vld [vmem:[#allocation8 + $0x230] sm:$0xff]  ;;  %v706_v55 = vld [vmem:[#allocation8 + $0x228] sm:$0xff] }
  0x9c   : > { %536 = vmatpush2.msra.mxu0 %v393_v58  ;;  %607 = vmatpush2.msra.mxu1 %v395_v59  ;;  %v641_v56 = vld [vmem:[#allocation8 + $0x20] sm:$0xff]  ;;  %v640_v58 = vld [vmem:[#allocation8 + $0x18] sm:$0xff] }
  0x9d   : > { %537 = vmatprep.subr.mxu0 %v390_v60  ;;  %608 = vmatprep.subr.mxu1 %v392_v61  ;;  %v705_v57 = vld [vmem:[#allocation8 + $0x220] sm:$0xff]  ;;  %v704_v59 = vld [vmem:[#allocation8 + $0x218] sm:$0xff]  ;;  %v639_v60 = vld [vmem:[#allocation8 + $0x10] sm:$0xff] }
  0x9e   : > { %538 = vmatpush2.msra.mxu0 %v389_v62  ;;  %539 = vmatprep.mubr.f32.mxu0 %v324_v63  ;;  %v703_v61 = vld [vmem:[#allocation8 + $0x210] sm:$0xff]  ;;  %v638_v62 = vld [vmem:[#allocation8 + $0x8] sm:$0xff] }
  0x9f   : > { %609 = vmatpush2.msra.mxu1 %v391_v0  ;;  %610 = vmatprep.mubr.f32.mxu1 %v324_v63  ;;  %v702_v63 = vld [vmem:[#allocation8 + $0x208] sm:$0xff]  ;;  %v637_v0 = vld [vmem:[#allocation8] sm:$0xff] }
  0xa0   : > { %540 = vmatmul.mubr.f32.vlgmr.msra.gmra.mxu0 %v323_v1  ;;  %611 = vmatmul.mubr.f32.vlgmr.msra.gmra.mxu1 %v323_v1  ;;  %v701_v1 = vld [vmem:[#allocation8 + $0x200] sm:$0xff] }
  0xa1   : > { %777 = vmatprep.subr.mxu0 %v668_v2  ;;  %848 = vmatprep.subr.mxu1 %v732_v3  ;;  %v700_v2 = vld [vmem:[#allocation8 + $0x1f8] sm:$0xff] }
  0xa2   : > { %778 = vmatpush1.msra.mxu0 %v667_v4  ;;  %849 = vmatpush1.msra.mxu1 %v731_v5  ;;  %v764_v3 = vld [vmem:[#allocation8 + $0x3f8] sm:$0xff]  ;;  %v699_v4 = vld [vmem:[#allocation8 + $0x1f0] sm:$0xff] }
  0xa3   : > { %779 = vmatprep.subr.mxu0 %v666_v6  ;;  %850 = vmatprep.subr.mxu1 %v730_v7  ;;  %v763_v5 = vld [vmem:[#allocation8 + $0x3f0] sm:$0xff]  ;;  %v698_v6 = vld [vmem:[#allocation8 + $0x1e8] sm:$0xff] }
  0xa4   : > { %780 = vmatpush1.msra.mxu0 %v665_v8  ;;  %851 = vmatpush1.msra.mxu1 %v729_v9  ;;  %v762_v7 = vld [vmem:[#allocation8 + $0x3e8] sm:$0xff]  ;;  %v697_v8 = vld [vmem:[#allocation8 + $0x1e0] sm:$0xff] }
  0xa5   : > { %781 = vmatprep.subr.mxu0 %v664_v10  ;;  %852 = vmatprep.subr.mxu1 %v728_v11  ;;  %v761_v9 = vld [vmem:[#allocation8 + $0x3e0] sm:$0xff]  ;;  %v696_v10 = vld [vmem:[#allocation8 + $0x1d8] sm:$0xff] }
  0xa6   : > { %782 = vmatpush1.msra.mxu0 %v663_v12  ;;  %853 = vmatpush1.msra.mxu1 %v727_v13  ;;  %v760_v11 = vld [vmem:[#allocation8 + $0x3d8] sm:$0xff]  ;;  %v695_v12 = vld [vmem:[#allocation8 + $0x1d0] sm:$0xff] }
  0xa7   : > { %783 = vmatprep.subr.mxu0 %v662_v14  ;;  %854 = vmatprep.subr.mxu1 %v726_v15  ;;  %v759_v13 = vld [vmem:[#allocation8 + $0x3d0] sm:$0xff]  ;;  %v694_v14 = vld [vmem:[#allocation8 + $0x1c8] sm:$0xff] }
  0xa8   : > { %784 = vmatpush1.msra.mxu0 %v661_v16  ;;  %855 = vmatpush1.msra.mxu1 %v725_v17  ;;  %v758_v15 = vld [vmem:[#allocation8 + $0x3c8] sm:$0xff]  ;;  %v693_v16 = vld [vmem:[#allocation8 + $0x1c0] sm:$0xff] }
  0xa9   : > { %785 = vmatprep.subr.mxu0 %v660_v18  ;;  %856 = vmatprep.subr.mxu1 %v724_v19  ;;  %v757_v17 = vld [vmem:[#allocation8 + $0x3c0] sm:$0xff]  ;;  %v692_v18 = vld [vmem:[#allocation8 + $0x1b8] sm:$0xff] }
  0xaa   : > { %786 = vmatpush1.msra.mxu0 %v659_v20  ;;  %857 = vmatpush1.msra.mxu1 %v723_v21  ;;  %v756_v19 = vld [vmem:[#allocation8 + $0x3b8] sm:$0xff]  ;;  %v691_v20 = vld [vmem:[#allocation8 + $0x1b0] sm:$0xff] }
  0xab   : > { %787 = vmatprep.subr.mxu0 %v658_v22  ;;  %858 = vmatprep.subr.mxu1 %v722_v23  ;;  %v755_v21 = vld [vmem:[#allocation8 + $0x3b0] sm:$0xff]  ;;  %v690_v22 = vld [vmem:[#allocation8 + $0x1a8] sm:$0xff] }
  0xac   : > { %788 = vmatpush1.msra.mxu0 %v657_v24  ;;  %859 = vmatpush1.msra.mxu1 %v721_v25  ;;  %v754_v23 = vld [vmem:[#allocation8 + $0x3a8] sm:$0xff]  ;;  %v689_v24 = vld [vmem:[#allocation8 + $0x1a0] sm:$0xff] }
  0xad   : > { %789 = vmatprep.subr.mxu0 %v656_v26  ;;  %860 = vmatprep.subr.mxu1 %v720_v27  ;;  %v753_v25 = vld [vmem:[#allocation8 + $0x3a0] sm:$0xff]  ;;  %v688_v26 = vld [vmem:[#allocation8 + $0x198] sm:$0xff] }
  0xae   : > { %790 = vmatpush1.msra.mxu0 %v655_v28  ;;  %861 = vmatpush1.msra.mxu1 %v719_v29  ;;  %v752_v27 = vld [vmem:[#allocation8 + $0x398] sm:$0xff]  ;;  %v687_v28 = vld [vmem:[#allocation8 + $0x190] sm:$0xff] }
  0xaf   : > { %791 = vmatprep.subr.mxu0 %v654_v30  ;;  %862 = vmatprep.subr.mxu1 %v718_v31  ;;  %v751_v29 = vld [vmem:[#allocation8 + $0x390] sm:$0xff]  ;;  %v686_v30 = vld [vmem:[#allocation8 + $0x188] sm:$0xff] }
  0xb0   : > { %792 = vmatpush1.msra.mxu0 %v653_v32  ;;  %863 = vmatpush1.msra.mxu1 %v717_v33  ;;  %v750_v31 = vld [vmem:[#allocation8 + $0x388] sm:$0xff]  ;;  %v685_v32 = vld [vmem:[#allocation8 + $0x180] sm:$0xff] }
  0xb1   : > { %793 = vmatprep.subr.mxu0 %v652_v34  ;;  %864 = vmatprep.subr.mxu1 %v716_v35  ;;  %v749_v33 = vld [vmem:[#allocation8 + $0x380] sm:$0xff]  ;;  %v684_v34 = vld [vmem:[#allocation8 + $0x178] sm:$0xff] }
  0xb2   : > { %794 = vmatpush1.msra.mxu0 %v651_v36  ;;  %865 = vmatpush1.msra.mxu1 %v715_v37  ;;  %v748_v35 = vld [vmem:[#allocation8 + $0x378] sm:$0xff]  ;;  %v683_v36 = vld [vmem:[#allocation8 + $0x170] sm:$0xff] }
  0xb3   : > { %795 = vmatprep.subr.mxu0 %v650_v38  ;;  %866 = vmatprep.subr.mxu1 %v714_v39  ;;  %v747_v37 = vld [vmem:[#allocation8 + $0x370] sm:$0xff]  ;;  %v682_v38 = vld [vmem:[#allocation8 + $0x168] sm:$0xff] }
  0xb4   : > { %796 = vmatpush1.msra.mxu0 %v649_v40  ;;  %867 = vmatpush1.msra.mxu1 %v713_v41  ;;  %v746_v39 = vld [vmem:[#allocation8 + $0x368] sm:$0xff]  ;;  %v681_v40 = vld [vmem:[#allocation8 + $0x160] sm:$0xff] }
  0xb5   : > { %797 = vmatprep.subr.mxu0 %v648_v42  ;;  %868 = vmatprep.subr.mxu1 %v712_v43  ;;  %v745_v41 = vld [vmem:[#allocation8 + $0x360] sm:$0xff]  ;;  %v680_v42 = vld [vmem:[#allocation8 + $0x158] sm:$0xff] }
  0xb6   : > { %798 = vmatpush1.msra.mxu0 %v647_v44  ;;  %869 = vmatpush1.msra.mxu1 %v711_v45  ;;  %v744_v43 = vld [vmem:[#allocation8 + $0x358] sm:$0xff]  ;;  %v679_v44 = vld [vmem:[#allocation8 + $0x150] sm:$0xff] }
  0xb7   : > { %799 = vmatprep.subr.mxu0 %v646_v46  ;;  %870 = vmatprep.subr.mxu1 %v710_v47  ;;  %v743_v45 = vld [vmem:[#allocation8 + $0x350] sm:$0xff]  ;;  %v678_v46 = vld [vmem:[#allocation8 + $0x148] sm:$0xff] }
  0xb8   : > { %800 = vmatpush1.msra.mxu0 %v645_v48  ;;  %871 = vmatpush1.msra.mxu1 %v709_v49  ;;  %v742_v47 = vld [vmem:[#allocation8 + $0x348] sm:$0xff]  ;;  %v677_v48 = vld [vmem:[#allocation8 + $0x140] sm:$0xff] }
  0xb9   : > { %801 = vmatprep.subr.mxu0 %v644_v50  ;;  %872 = vmatprep.subr.mxu1 %v708_v51  ;;  %v741_v49 = vld [vmem:[#allocation8 + $0x340] sm:$0xff]  ;;  %v676_v50 = vld [vmem:[#allocation8 + $0x138] sm:$0xff] }
  0xba   : > { %802 = vmatpush1.msra.mxu0 %v643_v52  ;;  %873 = vmatpush1.msra.mxu1 %v707_v53  ;;  %v740_v51 = vld [vmem:[#allocation8 + $0x338] sm:$0xff]  ;;  %v675_v52 = vld [vmem:[#allocation8 + $0x130] sm:$0xff] }
  0xbb   : > { %803 = vmatprep.subr.mxu0 %v642_v54  ;;  %874 = vmatprep.subr.mxu1 %v706_v55  ;;  %v739_v53 = vld [vmem:[#allocation8 + $0x330] sm:$0xff]  ;;  %v674_v54 = vld [vmem:[#allocation8 + $0x128] sm:$0xff] }
  0xbc   : > { %804 = vmatpush1.msra.mxu0 %v641_v56  ;;  %875 = vmatpush1.msra.mxu1 %v705_v57  ;;  %v738_v55 = vld [vmem:[#allocation8 + $0x328] sm:$0xff]  ;;  %v673_v56 = vld [vmem:[#allocation8 + $0x120] sm:$0xff] }
  0xbd   : > { %805 = vmatprep.subr.mxu0 %v640_v58  ;;  %876 = vmatprep.subr.mxu1 %v704_v59  ;;  %v737_v57 = vld [vmem:[#allocation8 + $0x320] sm:$0xff]  ;;  %v672_v58 = vld [vmem:[#allocation8 + $0x118] sm:$0xff] }
  0xbe   : > { %806 = vmatpush1.msra.mxu0 %v639_v60  ;;  %877 = vmatpush1.msra.mxu1 %v703_v61  ;;  %v736_v59 = vld [vmem:[#allocation8 + $0x318] sm:$0xff]  ;;  %v671_v60 = vld [vmem:[#allocation8 + $0x110] sm:$0xff] }
  0xbf   : > { %807 = vmatprep.subr.mxu0 %v638_v62  ;;  %878 = vmatprep.subr.mxu1 %v702_v63  ;;  %v735_v61 = vld [vmem:[#allocation8 + $0x310] sm:$0xff]  ;;  %v670_v62 = vld [vmem:[#allocation8 + $0x108] sm:$0xff] }
  0xc0   : > { %808 = vmatpush1.msra.mxu0 %v637_v0  ;;  %879 = vmatpush1.msra.mxu1 %v701_v1  ;;  %v734_v63 = vld [vmem:[#allocation8 + $0x308] sm:$0xff]  ;;  %v669_v0 = vld [vmem:[#allocation8 + $0x100] sm:$0xff] }
  0xc1   : > { %809 = vmatprep.subr.mxu0 %v700_v2  ;;  %880 = vmatprep.subr.mxu1 %v764_v3  ;;  %v733_v1 = vld [vmem:[#allocation8 + $0x300] sm:$0xff]  ;;  %v455_v2 = vlaneseq }
  0xc2   : > { %810 = vmatpush2.msra.mxu0 %v699_v4  ;;  %881 = vmatpush2.msra.mxu1 %v763_v5 }
  0xc3   : > { %811 = vmatprep.subr.mxu0 %v698_v6  ;;  %882 = vmatprep.subr.mxu1 %v762_v7  ;;  %v456_v3 = vshrl.u32 %v455_v2, 7  ;;  %v453_v6 = vld [vmem:[#allocation7] sm:$0xf] }
  0xc4   : > { %812 = vmatpush2.msra.mxu0 %v697_v8  ;;  %883 = vmatpush2.msra.mxu1 %v761_v9 }
  0xc5   : > { %813 = vmatprep.subr.mxu0 %v696_v10  ;;  %884 = vmatprep.subr.mxu1 %v760_v11  ;;  %v457_v4 = vsub.s32 0, %v456_v3  ;;  %v465_v5 = vsub.s32 2, %v456_v3  ;;  %v461_v7 = vsub.s32 1, %v456_v3  ;;  %v469_v8 = vsub.s32 3, %v456_v3 }
  0xc6   : > { %814 = vmatpush2.msra.mxu0 %v695_v12  ;;  %885 = vmatpush2.msra.mxu1 %v759_v13 }
  0xc7   : > { %815 = vmatprep.subr.mxu0 %v694_v14  ;;  %886 = vmatprep.subr.mxu1 %v758_v15  ;;  %v458_v9 = vrot.slane %v453_v6, %v457_v4  ;;  %v466_v10 = vrot.slane %v453_v6, %v465_v5  ;;  %v462_v13 = vrot.slane %v453_v6, %v461_v7 }
  0xc8   : > { %816 = vmatpush2.msra.mxu0 %v693_v16  ;;  %887 = vmatpush2.msra.mxu1 %v757_v17  ;;  %v470_v14 = vrot.slane %v453_v6, %v469_v8 }
  0xc9   : > { %817 = vmatprep.subr.mxu0 %v692_v18  ;;  %888 = vmatprep.subr.mxu1 %v756_v19 }
  0xca   : > { %818 = vmatpush2.msra.mxu0 %v691_v20  ;;  %889 = vmatpush2.msra.mxu1 %v755_v21 }
  0xcb   : > { %819 = vmatprep.subr.mxu0 %v690_v22  ;;  %890 = vmatprep.subr.mxu1 %v754_v23 }
  0xcc   : > { %820 = vmatpush2.msra.mxu0 %v689_v24  ;;  %891 = vmatpush2.msra.mxu1 %v753_v25 }
  0xcd   : > { %821 = vmatprep.subr.mxu0 %v688_v26  ;;  %892 = vmatprep.subr.mxu1 %v752_v27 }
  0xce   : > { %822 = vmatpush2.msra.mxu0 %v687_v28  ;;  %893 = vmatpush2.msra.mxu1 %v751_v29 }
  0xcf   : > { %823 = vmatprep.subr.mxu0 %v686_v30  ;;  %894 = vmatprep.subr.mxu1 %v750_v31 }
  0xd0   : > { %824 = vmatpush2.msra.mxu0 %v685_v32  ;;  %895 = vmatpush2.msra.mxu1 %v749_v33 }
  0xd1   : > { %825 = vmatprep.subr.mxu0 %v684_v34  ;;  %896 = vmatprep.subr.mxu1 %v748_v35 }
  0xd2   : > { %826 = vmatpush2.msra.mxu0 %v683_v36  ;;  %897 = vmatpush2.msra.mxu1 %v747_v37 }
  0xd3   : > { %827 = vmatprep.subr.mxu0 %v682_v38  ;;  %898 = vmatprep.subr.mxu1 %v746_v39 }
  0xd4   : > { %828 = vmatpush2.msra.mxu0 %v681_v40  ;;  %899 = vmatpush2.msra.mxu1 %v745_v41  ;;  %v765_v41 = vld [vmem:[%s1613_s4] sm:$0x3] }
  0xd5   : > { %829 = vmatprep.subr.mxu0 %v680_v42  ;;  %900 = vmatprep.subr.mxu1 %v744_v43  ;;  %v770_v42 = vrot.slane %v765_v41, %v457_v4  ;;  %v774_v43 = vrot.slane %v765_v41, %v461_v7 }
  0xd6   : > { %830 = vmatpush2.msra.mxu0 %v679_v44  ;;  %901 = vmatpush2.msra.mxu1 %v743_v45 }
  0xd7   : > { %831 = vmatprep.subr.mxu0 %v678_v46  ;;  %902 = vmatprep.subr.mxu1 %v742_v47 }
  0xd8   : > { %832 = vmatpush2.msra.mxu0 %v677_v48  ;;  %903 = vmatpush2.msra.mxu1 %v741_v49 }
  0xd9   : > { %833 = vmatprep.subr.mxu0 %v676_v50  ;;  %904 = vmatprep.subr.mxu1 %v740_v51 }
  0xda   : > { %834 = vmatpush2.msra.mxu0 %v675_v52  ;;  %905 = vmatpush2.msra.mxu1 %v739_v53 }
  0xdb   : > { %835 = vmatprep.subr.mxu0 %v674_v54  ;;  %906 = vmatprep.subr.mxu1 %v738_v55 }
  0xdc   : > { %836 = vmatpush2.msra.mxu0 %v673_v56  ;;  %907 = vmatpush2.msra.mxu1 %v737_v57 }
  0xdd   : > { %837 = vmatprep.subr.mxu0 %v672_v58  ;;  %908 = vmatprep.subr.mxu1 %v736_v59 }
  0xde   : > { %838 = vmatpush2.msra.mxu0 %v671_v60  ;;  %909 = vmatpush2.msra.mxu1 %v735_v61 }
  0xdf   : > { %839 = vmatprep.subr.mxu0 %v670_v62  ;;  %910 = vmatprep.subr.mxu1 %v734_v63 }
  0xe0   : > { %840 = vmatpush2.msra.mxu0 %v669_v0  ;;  %911 = vmatpush2.msra.mxu1 %v733_v1 }
 0x160   : > { %v541_v11 = vpop.f32.mrf.mxu0  ;;  %v612_v12 = vpop.f32.mrf.mxu1 }
 0x161   : > { %v542_v15 = vadd.f32 %v541_v11, %v458_v9  ;;  %v613_v16 = vadd.f32 %v612_v12, %v466_v10 }
 0x162   : > { %v543_v17 = vpop.f32.mrf.mxu0  ;;  %v614_v18 = vpop.f32.mrf.mxu1 }
 0x163   : > { %v621_v19 = vmul.f32 0.70710677, %v542_v15  ;;  %v623_v20 = vmul.f32 0.70710677, %v613_v16  ;;  %v544_v21 = vadd.f32 %v543_v17, %v462_v13  ;;  %v615_v22 = vadd.f32 %v614_v18, %v470_v14 }
 0x164   : > { %v617_v33 = vmul.f32 0.5, %v542_v15  ;;  %v619_v36 = vmul.f32 0.5, %v613_v16 }
 0x165   : > { %1169 = verf.f32 %v621_v19  ;;  %v622_v23 = vmul.f32 0.70710677, %v544_v21  ;;  %v624_v24 = vmul.f32 0.70710677, %v615_v22  ;;  %v618_v31 = vmul.f32 0.5, %v544_v21 }
 0x166   : > { %1171 = verf.f32 %v623_v20  ;;  %v620_v34 = vmul.f32 0.5, %v615_v22 }
 0x167   : > { %1173 = verf.f32 %v622_v23 }
 0x168   : > { %1175 = verf.f32 %v624_v24 }
 0x172   : > { %v1170_v25 = vpop.eup %1169 }
 0x173   : > { %v1172_v26 = vpop.eup %1171  ;;  %v629_v28 = vadd.f32 1.0, %v1170_v25 }
 0x174   : > { %v1174_v27 = vpop.eup %1173  ;;  %v631_v30 = vadd.f32 1.0, %v1172_v26 }
 0x175   : > { %v1176_v29 = vpop.eup %1175  ;;  %v630_v32 = vadd.f32 1.0, %v1174_v27  ;;  %v633_v38 = vmul.f32 %v629_v28, %v617_v33 }
 0x176   : > { %v632_v35 = vadd.f32 1.0, %v1176_v29  ;;  %v635_v40 = vmul.f32 %v631_v30, %v619_v36 }
 0x177   : > { %v634_v37 = vmul.f32 %v630_v32, %v618_v31 }
 0x178   : > { %v636_v39 = vmul.f32 %v632_v35, %v620_v34 }
 0x179   : > { %841 = vmatprep.mubr.f32.mxu0 %v634_v37 }
 0x17a   : > { %912 = vmatprep.mubr.f32.mxu1 %v636_v39  ;;  %842 = vmatmul.mubr.f32.vlgmr.msra.gmra.mxu0 %v633_v38 }
 0x17b   : > { %913 = vmatmul.mubr.f32.vlgmr.msra.gmra.mxu1 %v635_v40 }
 0x23a   : > { %v843_v44 = vpop.f32.mrf.mxu0 }
 0x23b   : > { %v844_v45 = vadd.f32 %v843_v44, %v770_v42  ;;  %v914_v46 = vpop.f32.mrf.mxu1 }
 0x23c   : > { %v845_v47 = vpop.f32.mrf.mxu0 }
 0x23d   : > { %v915_v48 = vadd.f32 %v914_v46, %v844_v45  ;;  %v846_v49 = vadd.f32 %v845_v47, %v774_v43  ;;  %v916_v50 = vpop.f32.mrf.mxu1 }
 0x23f   : > { %919 = vst [vmem:[%s319_s7] sm:$0xff] %v915_v48  ;;  %v917_v51 = vadd.f32 %v916_v50, %v846_v49 }
 0x241   : > { %920 = vst [vmem:[%s319_s7 + $0x8] sm:$0xff] %v917_v51 }
 0x242   : > { %1296 = shalt.err (!%p1293_p13)
}
 0x243   : > { %s1297_s12 = scalar_lea.hbm %s934_s11, 256  ;;  %s1301_s1 = scalar_lea.hbm %s1614_s5, 512 }
 0x244   : > { %p1298_p1 = scmp.ne.s32.totalorder %s934_s11, %s1297_s12  ;;  %p1302_p12 = scmp.lt.s32.totalorder %s934_s11, %s1614_s5 }
 0x245   : > { %p1303_p5 = scmp.lt.s32.totalorder %s1301_s1, %s1297_s12 }
 0x246   : > { %p1299_p4 = pnand %p1298_p1, %p1512_p0 }
 0x247   : > { %p1304_p3 = por %p1303_p5, %p1302_p12 }
 0x248   : > { %p1300_p8 = pneg %p1299_p4 }
 0x24a   : > { %p1305_p10 = pnand %p1304_p3, %p1300_p8 }
 0x24c   : > { %1308 = shalt.err (!%p1305_p10)
}
 0x24d   : > { %1086 = dma.vmem_to_hbm [thread:$0]  (%p1512_p0), %s937_s27, 256, %s934_s11, %s922_s13  }
 0x24e PF: > { %s948_s30 = sand.u32 1, %s1351_s18   ;;  %p1632_p2 = scmp.ne.s32.totalorder %s1623_s29, 0 }
 0x24f   : > { %p1633_p11 = scmp.ge.s32.totalorder %s1371_s23, 2  ;;  %s949_s7 = scalar_lea.sflag [#allocation4], %s948_s30 }
 0x251   : > { %p1103_p7 = pnand %p1633_p11, %p1632_p2 }
 0x253   : > { %p1104_p6 = pneg %p1103_p7 }
 0x255   : > { %1346 = dma.done.wait (%p1104_p6), %s949_s7, 256  }
 0x256   : > { %1348 = vsyncadd (%p1104_p6), %s949_s7, 4294967040  ;;  %s23_s23 = sadd.s32 1, %s1371_s23   ;;  %s1634_s18 = smov %s1355_s19 }
 0x257   : > { %p20_p9 = scmp.ge.s32.totalorder %s23_s23, 4   ;;  %s1635_s19 = smov %s1359_s20 }
 0x258   : > { %s1636_s20 = smov %s1524_s25  ;;  %s1637_s21 = smov %s1367_s22 }
 0x259   : > { %s1638_s22 = smov %s1640_s15  ;;  %22 = sbr.rel (!%p20_p9) target bundleno = 10 (0xa), region = 100 }
 0x25e   :  { %954 = vsyncpa [#allocation3], 1 }
 0x25f   :  { %956 = vsyncpa [#allocation3 + $0x1], 1 }
 0x260   :  { %957 = vsyncpa [#allocation6], 1 }
 0x261   :  { %958 = vsyncpa [#allocation9], 1 }
 0x262   :  { %959 = vsyncpa [#allocation4], 1 }
 0x263   :  { %961 = vsyncpa [#allocation4 + $0x1], 1 }

</bundles_post_ra>
